<compile_context>
chip_gen: v7x
topology: tpu7x:2x2x1
jax: 0.10.0
libtpu: 0.0.40
codegen_flags: <defaults>
</compile_context>

<pallas_src>
import functools
import numpy as np
import jax
import jax.numpy as jnp
from jax.experimental import pallas as pl
from jax.experimental.pallas import tpu as pltpu


def general_flip(h):
    m = (h - 1) // 2
    n = h // 2
    col = np.arange(0, m + 1)
    flipcol = -1 * np.flip(np.arange(1, n + 1))
    return np.concatenate((col, flipcol), 0)


def dist_weights(h, w):
    """sqrt(m^2 + n^2) weights, eq(8) of the paper — shape (H, W)."""
    concol = general_flip(h)[:, np.newaxis].astype(np.float64)
    conrow = general_flip(w)[np.newaxis, :].astype(np.float64)
    return np.sqrt(concol * concol + conrow * conrow)


@functools.lru_cache(maxsize=None)
def _energy_constants(n, h, w):
    """Per-axis ortho-DFT factors + folded weights, lane-padded to multiples of 128."""
    wc = w // 2 + 1
    wcp = ((wc + 127) // 128) * 128          # lane-aligned half-spectrum width

    # W-axis half-spectrum (rfft) ortho DFT; Re and Im fused side by side as the RHS of
    #   Ycat = X @ Fw_cat,  Ycat[:, :wcp] = Re(Y), Ycat[:, wcp:] = Im(Y); padding cols = 0.
    jw = np.arange(w)[:, None].astype(np.float64)
    kw = np.arange(wc)[None, :].astype(np.float64)
    ang_w = -2.0 * np.pi * jw * kw / w
    fw_cat = np.zeros((w, 2 * wcp), np.float64)
    fw_cat[:, :wc] = np.cos(ang_w) / np.sqrt(w)
    fw_cat[:, wcp:wcp + wc] = np.sin(ang_w) / np.sqrt(w)

    # H-axis ortho DFT in block-complex form:
    #   [[Ur],[Ui]] = [[Fr],[Fi]] @ Yr + [[-Fi],[Fr]] @ Yi
    jh = np.arange(h).astype(np.float64)
    ang_h = -2.0 * np.pi * np.outer(jh, jh) / h
    fh_re = np.cos(ang_h) / np.sqrt(h)
    fh_im = np.sin(ang_h) / np.sqrt(h)
    fb_l = np.concatenate([fh_re, fh_im], axis=0)    # (2H, H)
    fb_r = np.concatenate([-fh_im, fh_re], axis=0)   # (2H, H)

    # dist weights on the half spectrum: conjugate-symmetric columns doubled (all but DC,
    # and Nyquist when W is even), 1/(N*H*W) folded in, stacked twice to match the
    # [[Ur],[Ui]] layout, zero in the lane-padding columns.
    mult = np.full((wc,), 2.0)
    mult[0] = 1.0
    if w % 2 == 0:
        mult[-1] = 1.0
    half = dist_weights(h, w)[:, :wc] * mult[None, :] / float(n * h * w)
    wgt = np.zeros((2 * h, wcp), np.float64)
    wgt[:h, :wc] = half
    wgt[h:, :wc] = half

    return (jnp.asarray(fw_cat, jnp.bfloat16),
            jnp.asarray(fb_l, jnp.bfloat16),
            jnp.asarray(fb_r, jnp.bfloat16),
            jnp.asarray(wgt, jnp.float32),
            wcp)


def _choose_tb(n, h, w, wcp, budget_bytes):
    """Largest divisor of n (<=32) whose double-buffered input blocks fit the VMEM budget."""
    per_b = 2 * 2 * 2 * h * w                              # feat+label, bf16, double-buffered
    fixed = (2 * (w * 2 * wcp * 2 + 2 * (2 * h) * h * 2 + (2 * h) * wcp * 4)  # constants x2 bufs
             + 6 * (2 * h) * wcp * 4                        # accumulator + uu/sq/power temps
             + h * 2 * wcp * 6)                             # ycat f32 + bf16
    cap = max(1, (budget_bytes - fixed) // max(per_b, 1))
    cap = int(min(cap, 32, n))                              # unroll / compile-time cap
    tb = 1
    for d in range(1, cap + 1):
        if n % d == 0:
            tb = d
    return tb, fixed, per_b


def _energy_kernel(feat_ref, label_ref, fw_ref, fbl_ref, fbr_ref, wgt_ref,
                   o_ref, acc_ref, *, alpha, c0):
    tb = feat_ref.shape[0]
    wcp = wgt_ref.shape[1]
    s = pl.program_id(0)

    @pl.when(s == 0)
    def _init():
        acc_ref[...] = jnp.zeros_like(acc_ref)

    fw = fw_ref[...]         # (W, 2*Wcp)  fused Re|Im rfft RHS
    fbl = fbl_ref[...]       # (2H, H)     [[Fr],[Fi]]
    fbr = fbr_ref[...]       # (2H, H)     [[-Fi],[Fr]]

    power = None
    for b in range(tb):      # small static unroll (tb <= 32)
        # x = (0.5 - label) + alpha*(0.5 - feat) = c0 - label - alpha*feat        (H, W)
        xb = (c0 - label_ref[b].astype(jnp.float32)
              - alpha * feat_ref[b].astype(jnp.float32)).astype(jnp.bfloat16)
        # W-axis half-spectrum ortho DFT, re & im out of one matmul            (H, 2*Wcp)
        ycat = jnp.dot(xb, fw, preferred_element_type=jnp.float32).astype(jnp.bfloat16)
        # H-axis ortho DFT, block-complex form -> stacked [[Ur],[Ui]]           (2H, Wcp)
        uu = (jnp.dot(fbl, ycat[:, :wcp], preferred_element_type=jnp.float32)
              + jnp.dot(fbr, ycat[:, wcp:], preferred_element_type=jnp.float32))
        sq = uu * uu
        power = sq if power is None else power + sq

    # Pure VPU accumulation; weighting + cross-lane reduce deferred to finalize.
    acc_ref[...] = acc_ref[...] + power

    @pl.when(s == pl.num_programs(0) - 1)
    def _finalize():
        # Weights already include conjugate-symmetry doubling and 1/(N*H*W); the N-axis
        # ortho FFT is dropped exactly (unitary, batch-independent weights -> Parseval).
        o_ref[0, 0] = jnp.sum(wgt_ref[...] * acc_ref[...])


@functools.partial(jax.jit, static_argnums=2)
def energy_loss(feat, label, alpha):
    """feat: (N, H, W) float ; label: (N, 1, H, W) float (NCHW, C == 1). Returns scalar f32."""
    n, h, w = feat.shape
    assert label.shape == (n, 1, h, w)
    alpha = float(alpha)

    fw_cat, fb_l, fb_r, wgt, wcp = _energy_constants(n, h, w)

    # bf16 inputs: halves the HBM->VMEM DMA traffic (kernel is DMA-bound at real sizes).
    feat_bf = feat.reshape(n, h, w).astype(jnp.bfloat16)
    label_bf = label.reshape(n, h, w).astype(jnp.bfloat16)   # squeeze channel dim

    # Generation-aware VMEM budget (128 MiB on v5e/v6e, 64 MiB on v7x).
    try:
        vmem_cap = int(getattr(pltpu.get_tpu_info(), "vmem_capacity_bytes", 64 << 20))
    except Exception:
        vmem_cap = 64 << 20
    vmem_cap = max(vmem_cap, 32 << 20)

    tb, fixed_bytes, per_b_bytes = _choose_tb(n, h, w, wcp, int(0.6 * vmem_cap))
    steps = n // tb
    vmem_limit = int(min(0.75 * vmem_cap,
                         max(2 * (fixed_bytes + tb * per_b_bytes), 8 << 20)))

    kernel = functools.partial(_energy_kernel, alpha=alpha, c0=0.5 * (1.0 + alpha))

    out = pl.pallas_call(
        kernel,
        out_shape=jax.ShapeDtypeStruct((1, 1), jnp.float32),
        grid_spec=pltpu.PrefetchScalarGridSpec(
            num_scalar_prefetch=0,
            grid=(steps,),
            in_specs=[
                pl.BlockSpec((tb, h, w), lambda s: (s, 0, 0)),    # feat block (bf16)
                pl.BlockSpec((tb, h, w), lambda s: (s, 0, 0)),    # label block (bf16)
                pl.BlockSpec((w, 2 * wcp), lambda s: (0, 0)),     # fused Re|Im rfft RHS, resident
                pl.BlockSpec((2 * h, h), lambda s: (0, 0)),       # [[Fr],[Fi]],  resident
                pl.BlockSpec((2 * h, h), lambda s: (0, 0)),       # [[-Fi],[Fr]], resident
                pl.BlockSpec((2 * h, wcp), lambda s: (0, 0)),     # folded weights, resident
            ],
            out_specs=pl.BlockSpec(memory_space=pltpu.MemorySpace.SMEM),
            scratch_shapes=[pltpu.VMEM((2 * h, wcp), jnp.float32)],   # power-spectrum accumulator
        ),
        compiler_params=pltpu.CompilerParams(
            dimension_semantics=("arbitrary",),       # batch axis is the energy reduction
            vmem_limit_bytes=vmem_limit),
    )(feat_bf, label_bf, fw_cat, fb_l, fb_r, wgt)
    return out[0, 0]


if __name__ == "__main__":
    key = jax.random.PRNGKey(0)
    k1, k2 = jax.random.split(key)
    N, H, W = 2, 16, 16
    alpha = 0.35

    # feat: softmax probability (bf16 activation); label: binary mask (exact in bf16).
    feat = jax.random.uniform(k1, (N, H, W), jnp.float32).astype(jnp.bfloat16)
    label = (jax.random.uniform(k2, (N, 1, H, W)) > 0.5).astype(jnp.bfloat16)

    loss = jax.block_until_ready(energy_loss(feat, label, alpha))

    # numpy reference mirroring the PyTorch forward (full fftn over all 3 axes, norm='ortho'),
    # computed in float64 from the same bf16 inputs.
    feat_np = np.asarray(feat.astype(jnp.float32)).astype(np.float64)
    label_np = np.asarray(label.astype(jnp.float32)).astype(np.float64)
    x_np = (0.5 - label_np).squeeze(1) + alpha * (0.5 - feat_np)
    dmn = np.fft.fftn(x_np, norm="ortho")
    ref = np.sum(dist_weights(H, W) * np.abs(dmn) ** 2) / (N * H * W)

    # bf16 MXU operands (f32 accumulate) -> relaxed tolerance vs the f64 reference.
    assert np.allclose(float(loss), ref, rtol=3e-2, atol=1e-4), (float(loss), ref)
    print("KERNEL_OK")
</pallas_src>

<mosaic_0001>
module attributes {stable_mosaic.version = 11 : i64} {
  func.func @_energy_kernel(%arg0: i32, %arg1: memref<2x16x16xbf16, #tpu.memory_space<vmem>>, %arg2: memref<2x16x16xbf16, #tpu.memory_space<vmem>>, %arg3: memref<16x256xbf16, #tpu.memory_space<vmem>>, %arg4: memref<32x16xbf16, #tpu.memory_space<vmem>>, %arg5: memref<32x16xbf16, #tpu.memory_space<vmem>>, %arg6: memref<32x128xf32, #tpu.memory_space<vmem>>, %arg7: memref<1x1xf32, #tpu.memory_space<smem>>, %arg8: memref<32x128xf32, #tpu.memory_space<vmem>>) attributes {dimension_semantics = [#tpu.dimension_semantics<arbitrary>], iteration_bounds = array<i64: 1>, scalar_prefetch = 0 : i64, scratch_operands = 1 : i64, tpu.core_type = #tpu.core_type<tc>, window_params = [{transform_indices = @transform_0, window_bounds = array<i64: 2, 16, 16>}, {transform_indices = @transform_1, window_bounds = array<i64: 2, 16, 16>}, {pipeline_mode = #tpu.pipeline_mode<synchronous>, transform_indices = @transform_2, window_bounds = array<i64: 16, 256>}, {pipeline_mode = #tpu.pipeline_mode<synchronous>, transform_indices = @transform_3, window_bounds = array<i64: 32, 16>}, {pipeline_mode = #tpu.pipeline_mode<synchronous>, transform_indices = @transform_4, window_bounds = array<i64: 32, 16>}, {pipeline_mode = #tpu.pipeline_mode<synchronous>, transform_indices = @transform_5, window_bounds = array<i64: 32, 128>}, {transform_indices = @transform_6, window_bounds = array<i64: 1, 1>}]} {
    %c0_i32 = arith.constant 0 : i32
    %0 = arith.cmpi eq, %arg0, %c0_i32 : i32
    %1 = arith.extui %0 : i1 to i32
    %c0_i32_0 = arith.constant 0 : i32
    %2 = arith.cmpi ne, %1, %c0_i32_0 : i32
    scf.if %2 {
      %cst_32 = arith.constant 0.000000e+00 : f32
      %53 = vector.broadcast %cst_32 : f32 to vector<32x128xf32>
      %c0_33 = arith.constant 0 : index
      %c0_34 = arith.constant 0 : index
      %54 = vector.load %arg8[%c0_33, %c0_34] : memref<32x128xf32, #tpu.memory_space<vmem>>, vector<32x128xf32>
      tpu.vector_store %arg8[%c0_33, %c0_34], %53 {strides = array<i32>} : memref<32x128xf32, #tpu.memory_space<vmem>>, vector<32x128xf32>,
    } else {
    }
    %c0 = arith.constant 0 : index
    %c0_1 = arith.constant 0 : index
    %3 = vector.load %arg3[%c0, %c0_1] : memref<16x256xbf16, #tpu.memory_space<vmem>>, vector<16x256xbf16>
    %c0_2 = arith.constant 0 : index
    %c0_3 = arith.constant 0 : index
    %4 = vector.load %arg4[%c0_2, %c0_3] : memref<32x16xbf16, #tpu.memory_space<vmem>>, vector<32x16xbf16>
    %c0_4 = arith.constant 0 : index
    %c0_5 = arith.constant 0 : index
    %5 = vector.load %arg5[%c0_4, %c0_5] : memref<32x16xbf16, #tpu.memory_space<vmem>>, vector<32x16xbf16>
    %c0_6 = arith.constant 0 : index
    %c0_7 = arith.constant 0 : index
    %c0_8 = arith.constant 0 : index
    %6 = vector.load %arg2[%c0_6, %c0_7, %c0_8] : memref<2x16x16xbf16, #tpu.memory_space<vmem>>, vector<1x16x16xbf16>
    %7 = vector.shape_cast %6 : vector<1x16x16xbf16> to vector<16x16xbf16>
    %8 = arith.extf %7 : vector<16x16xbf16> to vector<16x16xf32>
    %cst = arith.constant 6.750000e-01 : f32
    %9 = vector.broadcast %cst : f32 to vector<16x16xf32>
    %10 = arith.subf %9, %8 : vector<16x16xf32>
    %c0_9 = arith.constant 0 : index
    %c0_10 = arith.constant 0 : index
    %c0_11 = arith.constant 0 : index
    %11 = vector.load %arg1[%c0_9, %c0_10, %c0_11] : memref<2x16x16xbf16, #tpu.memory_space<vmem>>, vector<1x16x16xbf16>
    %12 = vector.shape_cast %11 : vector<1x16x16xbf16> to vector<16x16xbf16>
    %13 = arith.extf %12 : vector<16x16xbf16> to vector<16x16xf32>
    %cst_12 = arith.constant 3.500000e-01 : f32
    %14 = vector.broadcast %cst_12 : f32 to vector<16x16xf32>
    %15 = arith.mulf %14, %13 : vector<16x16xf32>
    %16 = arith.subf %10, %15 : vector<16x16xf32>
    %17 = arith.truncf %16 : vector<16x16xf32> to vector<16x16xbf16>
    %cst_13 = arith.constant dense<0.000000e+00> : vector<16x256xf32>
    %18 = tpu.matmul %17, %3, %cst_13 {dimension_numbers = #tpu.dot_dimension_numbers<[1], [0], [0], [1], [0, 0, 1, 1], [], []>} : vector<16x16xbf16>, vector<16x256xbf16>, vector<16x256xf32> -> vector<16x256xf32>
    %19 = arith.truncf %18 : vector<16x256xf32> to vector<16x256xbf16>
    %20 = vector.extract_strided_slice %19 {offsets = [0, 0], sizes = [16, 128], strides = [1, 1]} : vector<16x256xbf16> to vector<16x128xbf16>
    %cst_14 = arith.constant dense<0.000000e+00> : vector<32x128xf32>
    %21 = tpu.matmul %4, %20, %cst_14 {dimension_numbers = #tpu.dot_dimension_numbers<[1], [0], [0], [1], [0, 0, 1, 1], [], []>} : vector<32x16xbf16>, vector<16x128xbf16>, vector<32x128xf32> -> vector<32x128xf32>
    %22 = vector.extract_strided_slice %19 {offsets = [0, 128], sizes = [16, 128], strides = [1, 1]} : vector<16x256xbf16> to vector<16x128xbf16>
    %cst_15 = arith.constant dense<0.000000e+00> : vector<32x128xf32>
    %23 = tpu.matmul %5, %22, %cst_15 {dimension_numbers = #tpu.dot_dimension_numbers<[1], [0], [0], [1], [0, 0, 1, 1], [], []>} : vector<32x16xbf16>, vector<16x128xbf16>, vector<32x128xf32> -> vector<32x128xf32>
    %24 = arith.addf %21, %23 : vector<32x128xf32>
    %25 = arith.mulf %24, %24 : vector<32x128xf32>
    %c1 = arith.constant 1 : index
    %c0_16 = arith.constant 0 : index
    %c0_17 = arith.constant 0 : index
    %26 = vector.load %arg2[%c1, %c0_16, %c0_17] : memref<2x16x16xbf16, #tpu.memory_space<vmem>>, vector<1x16x16xbf16>
    %27 = vector.shape_cast %26 : vector<1x16x16xbf16> to vector<16x16xbf16>
    %28 = arith.extf %27 : vector<16x16xbf16> to vector<16x16xf32>
    %cst_18 = arith.constant 6.750000e-01 : f32
    %29 = vector.broadcast %cst_18 : f32 to vector<16x16xf32>
    %30 = arith.subf %29, %28 : vector<16x16xf32>
    %c1_19 = arith.constant 1 : index
    %c0_20 = arith.constant 0 : index
    %c0_21 = arith.constant 0 : index
    %31 = vector.load %arg1[%c1_19, %c0_20, %c0_21] : memref<2x16x16xbf16, #tpu.memory_space<vmem>>, vector<1x16x16xbf16>
    %32 = vector.shape_cast %31 : vector<1x16x16xbf16> to vector<16x16xbf16>
    %33 = arith.extf %32 : vector<16x16xbf16> to vector<16x16xf32>
    %cst_22 = arith.constant 3.500000e-01 : f32
    %34 = vector.broadcast %cst_22 : f32 to vector<16x16xf32>
    %35 = arith.mulf %34, %33 : vector<16x16xf32>
    %36 = arith.subf %30, %35 : vector<16x16xf32>
    %37 = arith.truncf %36 : vector<16x16xf32> to vector<16x16xbf16>
    %cst_23 = arith.constant dense<0.000000e+00> : vector<16x256xf32>
    %38 = tpu.matmul %37, %3, %cst_23 {dimension_numbers = #tpu.dot_dimension_numbers<[1], [0], [0], [1], [0, 0, 1, 1], [], []>} : vector<16x16xbf16>, vector<16x256xbf16>, vector<16x256xf32> -> vector<16x256xf32>
    %39 = arith.truncf %38 : vector<16x256xf32> to vector<16x256xbf16>
    %40 = vector.extract_strided_slice %39 {offsets = [0, 0], sizes = [16, 128], strides = [1, 1]} : vector<16x256xbf16> to vector<16x128xbf16>
    %cst_24 = arith.constant dense<0.000000e+00> : vector<32x128xf32>
    %41 = tpu.matmul %4, %40, %cst_24 {dimension_numbers = #tpu.dot_dimension_numbers<[1], [0], [0], [1], [0, 0, 1, 1], [], []>} : vector<32x16xbf16>, vector<16x128xbf16>, vector<32x128xf32> -> vector<32x128xf32>
    %42 = vector.extract_strided_slice %39 {offsets = [0, 128], sizes = [16, 128], strides = [1, 1]} : vector<16x256xbf16> to vector<16x128xbf16>
    %cst_25 = arith.constant dense<0.000000e+00> : vector<32x128xf32>
    %43 = tpu.matmul %5, %42, %cst_25 {dimension_numbers = #tpu.dot_dimension_numbers<[1], [0], [0], [1], [0, 0, 1, 1], [], []>} : vector<32x16xbf16>, vector<16x128xbf16>, vector<32x128xf32> -> vector<32x128xf32>
    %44 = arith.addf %41, %43 : vector<32x128xf32>
    %45 = arith.mulf %44, %44 : vector<32x128xf32>
    %46 = arith.addf %25, %45 : vector<32x128xf32>
    %c0_26 = arith.constant 0 : index
    %c0_27 = arith.constant 0 : index
    %47 = vector.load %arg8[%c0_26, %c0_27] : memref<32x128xf32, #tpu.memory_space<vmem>>, vector<32x128xf32>
    %48 = arith.addf %47, %46 : vector<32x128xf32>
    %c0_28 = arith.constant 0 : index
    %c0_29 = arith.constant 0 : index
    %49 = vector.load %arg8[%c0_28, %c0_29] : memref<32x128xf32, #tpu.memory_space<vmem>>, vector<32x128xf32>
    tpu.vector_store %arg8[%c0_28, %c0_29], %48 {strides = array<i32>} : memref<32x128xf32, #tpu.memory_space<vmem>>, vector<32x128xf32>,
    %c0_i32_30 = arith.constant 0 : i32
    %50 = arith.cmpi eq, %arg0, %c0_i32_30 : i32
    %51 = arith.extui %50 : i1 to i32
    %c0_i32_31 = arith.constant 0 : i32
    %52 = arith.cmpi ne, %51, %c0_i32_31 : i32
    scf.if %52 {
      %c0_32 = arith.constant 0 : index
      %c0_33 = arith.constant 0 : index
      %53 = vector.load %arg6[%c0_32, %c0_33] : memref<32x128xf32, #tpu.memory_space<vmem>>, vector<32x128xf32>
      %c0_34 = arith.constant 0 : index
      %c0_35 = arith.constant 0 : index
      %54 = vector.load %arg8[%c0_34, %c0_35] : memref<32x128xf32, #tpu.memory_space<vmem>>, vector<32x128xf32>
      %55 = arith.mulf %53, %54 : vector<32x128xf32>
      %56 = vector.shape_cast %55 : vector<32x128xf32> to vector<1x32x128xf32>
      %cst_36 = arith.constant dense<0.000000e+00> : vector<1xf32>
      %57 = vector.multi_reduction <add>, %56, %cst_36 [1, 2] : vector<1x32x128xf32> to vector<1xf32>
      %58 = vector.shape_cast %57 : vector<1xf32> to vector<1x1x1xf32>
      %59 = vector.extract %58[0, 0, 0] : f32 from vector<1x1x1xf32>
      %c0_37 = arith.constant 0 : index
      %c0_38 = arith.constant 0 : index
      %60 = memref.load %arg7[%c0_37, %c0_38] : memref<1x1xf32, #tpu.memory_space<smem>>
      memref.store %59, %arg7[%c0_37, %c0_38] : memref<1x1xf32, #tpu.memory_space<smem>>
    } else {
    }
    return
  }
  func.func @transform_0(%arg0: i32) -> (i32, i32, i32) {
    %c0_i32 = arith.constant 0 : i32
    %c0_i32_0 = arith.constant 0 : i32
    %c0_i32_1 = arith.constant 0 : i32
    return %arg0, %c0_i32, %c0_i32_0 : i32, i32, i32
  }
  func.func @transform_1(%arg0: i32) -> (i32, i32, i32) {
    %c0_i32 = arith.constant 0 : i32
    %c0_i32_0 = arith.constant 0 : i32
    %c0_i32_1 = arith.constant 0 : i32
    return %arg0, %c0_i32, %c0_i32_0 : i32, i32, i32
  }
  func.func @transform_2(%arg0: i32) -> (i32, i32) {
    %c0_i32 = arith.constant 0 : i32
    %c0_i32_0 = arith.constant 0 : i32
    %c0_i32_1 = arith.constant 0 : i32
    return %c0_i32, %c0_i32_0 : i32, i32
  }
  func.func @transform_3(%arg0: i32) -> (i32, i32) {
    %c0_i32 = arith.constant 0 : i32
    %c0_i32_0 = arith.constant 0 : i32
    %c0_i32_1 = arith.constant 0 : i32
    return %c0_i32, %c0_i32_0 : i32, i32
  }
  func.func @transform_4(%arg0: i32) -> (i32, i32) {
    %c0_i32 = arith.constant 0 : i32
    %c0_i32_0 = arith.constant 0 : i32
    %c0_i32_1 = arith.constant 0 : i32
    return %c0_i32, %c0_i32_0 : i32, i32
  }
  func.func @transform_5(%arg0: i32) -> (i32, i32) {
    %c0_i32 = arith.constant 0 : i32
    %c0_i32_0 = arith.constant 0 : i32
    %c0_i32_1 = arith.constant 0 : i32
    return %c0_i32, %c0_i32_0 : i32, i32
  }
  func.func @transform_6(%arg0: i32) -> (i32, i32) {
    %c0_i32 = arith.constant 0 : i32
    %c0_i32_0 = arith.constant 0 : i32
    %c0_i32_1 = arith.constant 0 : i32
    return %c0_i32, %c0_i32_0 : i32, i32
  }
}

</mosaic_0001>

<bundles_post_ra>
// kernel: energy_loss.1
= control target key start
LH: loop header
LB: loop body
LE: loop exit
PB: predicated region body
PF: predicated region fallthrough
CT: control target
= control target key end

     0   :  { %11 = vsyncpa [#allocation4], 0  ;;  %s836_s0 = inlined_call_operand.vmem [shape: bf16[2,16,16], index: 0, kind: input, shape index: {}]   ;;  %s837_s1 = inlined_call_operand.hbm [shape: bf16[2,16,16], index: 1, kind: input, shape index: {}]   ;;  %s838_s2 = inlined_call_operand.vmem [shape: bf16[16,256], index: 2, kind: input, shape index: {}]   ;;  %s839_s3 = inlined_call_operand.hbm [shape: bf16[32,16], index: 3, kind: input, shape index: {}]   ;;  %s840_s4 = inlined_call_operand.hbm [shape: bf16[32,16], index: 4, kind: input, shape index: {}]   ;;  %s841_s5 = inlined_call_operand.vmem [shape: f32[32,128], index: 5, kind: input, shape index: {}]   ;;  %s842_s6 = inlined_call_operand.hbm [shape: f32[1,1], index: 6, kind: output, shape index: {}]  }
   0x1   :  { %12 = vsyncpa [#allocation7], 0 }
   0x2   :  { %13 = vsyncpa [#allocation5], 0  ;;  %s696_s21 = smov [#allocation6]   ;;  %s697_s23 = smov [#allocation3]  }
   0x3   :  { %s35_s22 = sshll.u32 %s696_s21, 4  ;;  %s21_s24 = sshll.u32 %s697_s23, 4  ;;  %s36_s22 = int_to_ptr.vmem [resolvable:$true] %s35_s22  ;;  %s738_s24 = int_to_ptr.vmem [resolvable:$true] %s21_s24 }
   0x4   :  { %s614_s27 = scalar_lea.hbm %s839_s3, 256 }
   0x5   :  { %p615_p0 = scmp.ne.s32.totalorder %s839_s3, %s614_s27  ;;  %p618_p1 = scmp.lt.u32.totalorder %s614_s27, %s839_s3 }
   0x7   :  { %p620_p2 = pnand %p618_p1, %p615_p0 }
   0x9   :  { %623 = shalt.err (!%p620_p2)
}
   0xa   :  { %s624_s8 = scalar_lea.vmem %s36_s22, 256  ;;  %p629_p4 = scmp.lt.s32.totalorder %s36_s22, %s36_s22 }
   0xb   :  { %p625_p3 = scmp.ne.s32.totalorder %s36_s22, %s624_s8  ;;  %p630_p5 = scmp.lt.s32.totalorder %s624_s8, %s624_s8 }
   0xd   :  { %p631_p6 = por %p630_p5, %p629_p4 }
   0xf   :  { %p632_p7 = pnand %p631_p6, %p625_p3 }
  0x11   :  { %635 = shalt.err (!%p632_p7)
}
  0x12   :  { %s698_s9 = smov 64   ;;  %s699_s10 = smov 4  }
  0x13   :  { %41 = dma.hbm_to_vmem [thread:$0]  %s839_s3, 256, %s36_s22, [#allocation7], %s698_s9, %s698_s9, %s699_s10  }
  0x14   :  { %s636_s15 = scalar_lea.hbm %s837_s1, 256 }
  0x15   :  { %p637_p8 = scmp.ne.s32.totalorder %s837_s1, %s636_s15  ;;  %p640_p9 = scmp.lt.u32.totalorder %s636_s15, %s837_s1 }
  0x17   :  { %p642_p10 = pnand %p640_p9, %p637_p8 }
  0x19   :  { %645 = shalt.err (!%p642_p10)
}
  0x1a   :  { %s646_s20 = scalar_lea.vmem %s738_s24, 256  ;;  %p651_p12 = scmp.lt.s32.totalorder %s738_s24, %s738_s24 }
  0x1b   :  { %p647_p11 = scmp.ne.s32.totalorder %s738_s24, %s646_s20  ;;  %p652_p13 = scmp.lt.s32.totalorder %s646_s20, %s646_s20 }
  0x1d   :  { %p653_p0 = por %p652_p13, %p651_p12 }
  0x1f   :  { %p654_p1 = pnand %p653_p0, %p647_p11 }
  0x21   :  { %657 = shalt.err (!%p654_p1)
}
  0x22   :  { %27 = dma.hbm_to_vmem [thread:$0]  %s837_s1, 256, %s738_s24, [#allocation4], %s698_s9, %s698_s9, %s699_s10  }
  0x23   :  { %s700_s22 = smov [#allocation8]   ;;  %s658_s27 = scalar_lea.hbm %s840_s4, 256 }
  0x24   :  { %s47_s23 = sshll.u32 %s700_s22, 4  ;;  %p659_p2 = scmp.ne.s32.totalorder %s840_s4, %s658_s27  ;;  %s48_s23 = int_to_ptr.vmem [resolvable:$true] %s47_s23 }
  0x25   :  { %p662_p3 = scmp.lt.u32.totalorder %s658_s27, %s840_s4 }
  0x27   :  { %p664_p4 = pnand %p662_p3, %p659_p2 }
  0x29   :  { %667 = shalt.err (!%p664_p4)
}
  0x2a   :  { %s668_s8 = scalar_lea.vmem %s48_s23, 256  ;;  %p673_p6 = scmp.lt.s32.totalorder %s48_s23, %s48_s23 }
  0x2b   :  { %p669_p5 = scmp.ne.s32.totalorder %s48_s23, %s668_s8  ;;  %p674_p7 = scmp.lt.s32.totalorder %s668_s8, %s668_s8 }
  0x2d   :  { %p675_p8 = por %p674_p7, %p673_p6 }
  0x2f   :  { %p676_p9 = pnand %p675_p8, %p669_p5 }
  0x31   :  { %679 = shalt.err (!%p676_p9)
}
  0x32   :  { %53 = dma.hbm_to_vmem [thread:$0]  %s840_s4, 256, %s48_s23, [#allocation7], %s698_s9, %s698_s9, %s699_s10  }
  0x33   :  { %690 = dma.done.wait [#allocation4], 256  }
  0x34   :  { %691 = vsyncadd [#allocation4], 4294967040 }
  0x35   :  { %692 = dma.done.wait [#allocation7], 512  }
  0x36   :  { %693 = vsyncadd [#allocation7], 4294966784  ;;  %v701_v0 = vmov 0   ;;  %v607_v1 = vld [vmem:[%s838_s2 + $0x4] ss:$8 sps:$4 sm:$0xff]   ;;  %vm109_vm0 = vcmask 130048  }
  0x37   :  { %145 = vmatprep.mubr.bf16.mxu1 %v701_v0  ;;  %344 = vmatprep.mubr.bf16.mxu0 %v701_v0  ;;  %v609_v2 = vld [vmem:[%s838_s2] ss:$8 sps:$4 sm:$0xff]   ;;  %v612_v43 = vld [vmem:[#allocation6] sm:$0xff]   ;;  %v613_v44 = vld [vmem:[#allocation6 + $0x8] sm:$0xff]  }
  0x38   :  { %v538_v3 = vld [vmem:[#allocation3] sm:$0xff]   ;;  %113 = vmatprep.subr.bf16.mxu1 %v607_v1  ;;  %312 = vmatprep.subr.bf16.mxu0 %v607_v1  ;;  %v546_v9 = vld [vmem:[#allocation3 + $0x8] sm:$0xff]  }
  0x39   :  { %v542_v4 = vld [vmem:[%s836_s0] sm:$0xff]   ;;  %v539_v5 = vunpack.c.l.bf16 %v538_v3  ;;  %v540_v6 = vunpack.c.h.bf16 %v538_v3  ;;  %v553_v10 = vld [vmem:[%s836_s0 + $0x8] sm:$0xff]   ;;  %114 = vmatpush1.bf16.msra.mxu1 %v609_v2  ;;  %313 = vmatpush1.bf16.msra.mxu0 %v609_v2  ;;  %v547_v11 = vunpack.c.l.bf16 %v546_v9  ;;  %v548_v12 = vunpack.c.h.bf16 %v546_v9  ;;  %v480_v3 = vld [vmem:[%s841_s5 + $0x10] sm:$0xff] }
  0x3a   :  { %v543_v7 = vunpack.c.l.bf16 %v542_v4  ;;  %v544_v8 = vunpack.c.h.bf16 %v542_v4  ;;  %v551_v13 = vunpack.c.l.bf16 %v553_v10  ;;  %v552_v14 = vunpack.c.h.bf16 %v553_v10  ;;  %v610_v29 = vld [vmem:[#allocation8] sm:$0xff]   ;;  %v611_v42 = vld [vmem:[#allocation8 + $0x8] sm:$0xff]  }
  0x3b   :  { %v88_v15 = vsub.f32 0.675, %v539_v5  ;;  %v89_v16 = vsub.f32 0.675, %v540_v6  ;;  %v297_v19 = vsub.f32 0.675, %v547_v11 }
  0x3c   :  { %v94_v17 = vmul.f32 0.35, %v543_v7  ;;  %v95_v18 = vmul.f32 0.35, %v544_v8  ;;  %v298_v20 = vsub.f32 0.675, %v548_v12 }
  0x3d   :  { %v304_v22 = vmul.f32 0.35, %v551_v13  ;;  %v305_v23 = vmul.f32 0.35, %v552_v14  ;;  %v478_v63 = vld [vmem:[%s841_s5] sm:$0xff]  ;;  %v479_v1 = vld [vmem:[%s841_s5 + $0x8] sm:$0xff] }
  0x3e   :  { %v96_v21 = vsub.f32 %v88_v15, %v94_v17  ;;  %v97_v24 = vsub.f32 %v89_v16, %v95_v18  ;;  %v481_v6 = vld [vmem:[%s841_s5 + $0x18] sm:$0xff]  ;;  %s680_s5 = scalar_lea.hbm %s842_s6, 16 }
  0x3f   :  { %v306_v25 = vsub.f32 %v297_v19, %v304_v22  ;;  %v307_v26 = vsub.f32 %v298_v20, %v305_v23  ;;  %p681_p10 = scmp.ne.s32.totalorder %s842_s6, %s680_s5  ;;  %p684_p11 = scmp.lt.u32.totalorder %s680_s5, %s842_s6 }
  0x40   :  { %v98_v27 = vpack.c.bf16 %v97_v24, %v96_v21 }
  0x41   :  { %v308_v28 = vpack.c.bf16 %v307_v26, %v306_v25  ;;  %p686_p12 = pnand %p684_p11, %p681_p10 }
  0x42   :  { %521 = vmatmul.mubr.msk.bf16.vlgmr.msra.gmra.mrb[0].mxu1 %vm109_vm0, %v98_v27 }
  0x43   :  { %532 = vmatmul.mubr.msk.bf16.vlgmr.msra.gmra.mrb[0].mxu0 %vm109_vm0, %v308_v28  ;;  %568 = vmatprep.mubr.msk.bf16.mxu1 %vm109_vm0, %v610_v29 }
  0x44   :  { %580 = vmatprep.mubr.msk.bf16.mxu0 %vm109_vm0, %v610_v29 }
 0x115   :  { %v147_v30 = vpop.f32.mrb[0].mxu1 }
 0x116   :  { %v346_v31 = vpop.f32.mrb[0].mxu0  ;;  %v149_v32 = vpop.f32.mrb[1].mxu1 }
 0x117   :  { %v348_v33 = vpop.f32.mrb[1].mxu0  ;;  %v151_v34 = vpop.f32.mrb[2].mxu1 }
 0x118   :  { %v156_v35 = vpack.c.bf16 %v151_v34, %v147_v30  ;;  %v350_v36 = vpop.f32.mrb[2].mxu0  ;;  %v153_v37 = vpop.f32.mrb[3].mxu1 }
 0x119   :  { %v355_v38 = vpack.c.bf16 %v350_v36, %v346_v31  ;;  %v157_v39 = vpack.c.bf16 %v153_v37, %v149_v32  ;;  %v352_v40 = vpop.f32.mrb[3].mxu0 }
 0x11a   :  { %v356_v41 = vpack.c.bf16 %v352_v40, %v348_v33 }
 0x11b   :  { %566 = vmatprep.subr.bf16.mxu1 %v157_v39 }
 0x11c   :  { %578 = vmatprep.subr.bf16.mxu0 %v356_v41  ;;  %567 = vmatpush3.bf16.msra.mxu1 %v157_v39 }
 0x11d   :  { %579 = vmatpush3.bf16.msra.mxu0 %v356_v41  ;;  %572 = vmatprep.subr.bf16.mxu1 %v156_v35 }
 0x11e   :  { %584 = vmatprep.subr.bf16.mxu0 %v355_v38 }
 0x11f   :  { %569 = vmatmul.mubr.msk.bf16.vlgmr.msra.gmra.mrb[4].mxu1 %vm109_vm0, %v611_v42 }
 0x120   :  { %581 = vmatmul.mubr.msk.bf16.vlgmr.msra.gmra.mrb[4].mxu0 %vm109_vm0, %v611_v42  ;;  %573 = vmatpush3.bf16.msra.mxu1 %v156_v35 }
 0x121   :  { %585 = vmatpush3.bf16.msra.mxu0 %v355_v38  ;;  %574 = vmatprep.mubr.msk.bf16.mxu1 %vm109_vm0, %v612_v43 }
 0x122   :  { %586 = vmatprep.mubr.msk.bf16.mxu0 %vm109_vm0, %v612_v43 }
 0x12b   :  { %575 = vmatmul.mubr.msk.bf16.vlgmr.msra.gmra.mrb[4].mxu1 %vm109_vm0, %v613_v44 }
 0x12c   :  { %587 = vmatmul.mubr.msk.bf16.vlgmr.msra.gmra.mrb[4].mxu0 %vm109_vm0, %v613_v44 }
 0x1fe   :  { %v576_v45 = vpop.f32.mrb[4].mxu1 }
 0x1ff   :  { %v290_v46 = vmul.f32 %v576_v45, %v576_v45  ;;  %v588_v47 = vpop.f32.mrb[4].mxu0  ;;  %v273_v48 = vpop.f32.mrb[5].mxu1 }
 0x200   :  { %v457_v49 = vmul.f32 %v588_v47, %v588_v47  ;;  %v288_v50 = vmul.f32 %v273_v48, %v273_v48  ;;  %v440_v51 = vpop.f32.mrb[5].mxu0  ;;  %v577_v52 = vpop.f32.mrb[6].mxu1 }
 0x201   :  { %v455_v53 = vmul.f32 %v440_v51, %v440_v51  ;;  %v291_v54 = vmul.f32 %v577_v52, %v577_v52  ;;  %v589_v55 = vpop.f32.mrb[6].mxu0  ;;  %v276_v56 = vpop.f32.mrb[7].mxu1 }
 0x202   :  { %v461_v57 = vadd.f32 %v457_v49, %v290_v46  ;;  %v458_v58 = vmul.f32 %v589_v55, %v589_v55  ;;  %v289_v59 = vmul.f32 %v276_v56, %v276_v56  ;;  %v443_v60 = vpop.f32.mrb[7].mxu0 }
 0x203   :  { %v459_v61 = vadd.f32 %v455_v53, %v288_v50  ;;  %v456_v62 = vmul.f32 %v443_v60, %v443_v60 }
 0x204   :  { %v462_v0 = vadd.f32 %v458_v58, %v291_v54  ;;  %v488_v7 = vmul.f32 %v480_v3, %v461_v57 }
 0x205   :  { %v460_v2 = vadd.f32 %v456_v62, %v289_v59  ;;  %v486_v4 = vmul.f32 %v478_v63, %v459_v61 }
 0x206   :  { %v489_v9 = vmul.f32 %v481_v6, %v462_v0 }
 0x207   :  { %v487_v5 = vmul.f32 %v479_v1, %v460_v2 }
 0x209   :  { %v490_v8 = vadd.f32 %v487_v5, %v486_v4 }
 0x20b   :  { %v491_v10 = vadd.f32 %v490_v8, %v488_v7 }
 0x20d   :  { %v492_v11 = vadd.f32 %v491_v10, %v489_v9 }
 0x20f   :  { %493 = vadd.xlane.f32.xlu0 %v492_v11 }
 0x29c   :  { %v494_v12 = vpop.xlane.xlu0 %493 }
 0x29d   :  { %v495_v13 = vrot.slane %v494_v12, 4 }
 0x29f   :  { %v496_v14 = vadd.f32 %v495_v13, %v494_v12 }
 0x2a1   :  { %v497_v15 = vrot.slane %v496_v14, 2 }
 0x2a3   :  { %v498_v16 = vadd.f32 %v497_v15, %v496_v14 }
 0x2a5   :  { %v499_v17 = vrot.slane %v498_v16, 1 }
 0x2a7   :  { %v500_v18 = vadd.f32 %v499_v17, %v498_v16 }
 0x2a9   :  { %598 = vpush %v500_v18 }
 0x2da   :  { %s599_s21 = spop %598 }
 0x2db   :  { %503 = sst [smem:[#allocation9]] %s599_s21 }
 0x2dc   :  { %689 = shalt.err (!%p686_p12)
}
 0x2dd   :  { %s702_s29 = smov [#allocation9]  }
 0x2de   :  { %511 = dma.smem_to_hbm %s702_s29, 16, %s842_s6, [#allocation5]  }
 0x2df   :  { %694 = dma.done.wait [#allocation5], 16  }
 0x2e0   :  { %695 = vsyncadd [#allocation5], 4294967280 }
 0x2e1   :  { %515 = sfence }
 0x2e2   :  { %516 = vsyncpa [#allocation4], 1 }
 0x2e3   :  { %517 = vsyncpa [#allocation7], 1 }
 0x2e4   :  { %518 = vsyncpa [#allocation5], 1 }

</bundles_post_ra>
